<compile_context>
chip_gen: v5e
topology: v5e:2x2
jax: 0.10.0
libtpu: 0.0.40
codegen_flags: <defaults>
</compile_context>

<pallas_src>
import functools

import jax
import jax.numpy as jnp
from jax import lax
from jax.experimental import pallas as pl
from jax.experimental.pallas import tpu as pltpu

C = 10          # number of hidden-layer reapplications (matches module-level C)
LANES = 128     # TPU lane width
SUBLANES = 8    # TPU sublane count


def _round_up(x, m):
    return ((x + m - 1) // m) * m


def _default_num_tiles():
    """1 batch tile on single-TC chips (v5e/v6e), 2 on dual-TC v7x."""
    try:
        kind = jax.devices()[0].device_kind.lower()
    except Exception:  # pragma: no cover - defensive
        return 1
    return 2 if "v7" in kind else 1


# ---------------------------------------------------------------------------
# Kernel
# ---------------------------------------------------------------------------
def two_layer_net_kernel(x_ref, w1_ref, b1_ref, wh_ref, bh_ref,
                         w2_ref, b2_ref, o_ref):
    # Biases stay as (1, N) sublane-replicated operands; the broadcast in the
    # adds is free per-op and keeps vreg pressure low across the unrolled chain.
    b1 = b1_ref[...]
    bh = bh_ref[...]
    b2 = b2_ref[...]
    wh = wh_ref[...]

    # linear1 + relu (f32 accumulation on the MXU).
    h = jnp.dot(x_ref[...], w1_ref[...], preferred_element_type=jnp.float32)
    h = jnp.maximum(h + b1, 0.0)

    # C repeated applications of the SAME hidden linear + relu.
    # TODO(synk): the Python `print('holi')` inside the PyTorch loop is a
    # host-side side effect with no device equivalent; intentionally omitted.
    def body(_, h):
        z = jnp.dot(h, wh, preferred_element_type=jnp.float32)
        return jnp.maximum(z + bh, 0.0)

    h = lax.fori_loop(0, C, body, h, unroll=True)

    # linear2 (no activation), lane-dense (padded) output columns.
    y = jnp.dot(h, w2_ref[...], preferred_element_type=jnp.float32)
    o_ref[...] = (y + b2).astype(o_ref.dtype)


# ---------------------------------------------------------------------------
# Jitted forward (batch pad + pallas_call + slice, all fused under one jit)
# ---------------------------------------------------------------------------
@functools.partial(jax.jit, static_argnames=("tile_b", "d_out"))
def _forward_jit(x, w1, b1, wh, bh, w2, b2, *, tile_b, d_out):
    B, D_in = x.shape
    H_p = wh.shape[0]
    D_out_p = w2.shape[1]

    B_p = _round_up(B, tile_b)
    if B_p != B:
        x = jnp.pad(x, ((0, B_p - B), (0, 0)))
    grid = (B_p // tile_b,)

    resident = lambda i: (0, 0)  # weights/biases pinned in VMEM across grid steps

    flops = 2 * B_p * (D_in * H_p + C * H_p * H_p + H_p * D_out_p)
    bytes_accessed = 4 * (B_p * D_in + B_p * D_out_p
                          + D_in * H_p + H_p * H_p + H_p * D_out_p
                          + 2 * H_p + D_out_p)

    out = pl.pallas_call(
        two_layer_net_kernel,
        out_shape=jax.ShapeDtypeStruct((B_p, D_out_p), jnp.float32),
        grid=grid,
        in_specs=[
            pl.BlockSpec((tile_b, D_in), lambda i: (i, 0)),   # x tile
            pl.BlockSpec((D_in, H_p), resident),              # w1 (H padded)
            pl.BlockSpec((1, H_p), resident),                 # b1
            pl.BlockSpec((H_p, H_p), resident),               # wh
            pl.BlockSpec((1, H_p), resident),                 # bh
            pl.BlockSpec((H_p, D_out_p), resident),           # w2 (padded)
            pl.BlockSpec((1, D_out_p), resident),             # b2 (padded)
        ],
        out_specs=pl.BlockSpec((tile_b, D_out_p), lambda i: (i, 0)),
        compiler_params=pltpu.CompilerParams(
            dimension_semantics=("parallel",)),
        cost_estimate=pl.CostEstimate(
            flops=flops, transcendentals=0, bytes_accessed=bytes_accessed),
    )(x, w1, b1, wh, bh, w2, b2)

    return out[:B, :d_out]


def two_layer_net_forward(x, prepped, d_out, *, num_tiles=None):
    """x: (B, D_in) float32.  prepped: output of prepare_params().  d_out: int."""
    if num_tiles is None:
        num_tiles = _default_num_tiles()
    B = x.shape[0]
    # Batch tile: ceil(B / num_tiles) rounded up to a multiple of 8 sublanes.
    tile_b = max(SUBLANES, _round_up(-(-B // num_tiles), SUBLANES))
    return _forward_jit(x, prepped["w1"], prepped["b1"], prepped["wh"],
                        prepped["bh"], prepped["w2"], prepped["b2"],
                        tile_b=tile_b, d_out=d_out)


# ---------------------------------------------------------------------------
# One-time parameter prep: pad H and D_out to full lane width (zeros).
# Padded hidden columns stay exactly 0 through the ReLU chain (zero weights,
# zero bias), so the math is identical to the unpadded network.
# ---------------------------------------------------------------------------
def prepare_params(params):
    w1, b1, wh, bh, w2, b2 = (params["w1"], params["b1"], params["wh"],
                              params["bh"], params["w2"], params["b2"])
    D_in, H = w1.shape
    D_out = w2.shape[1]
    H_p = max(LANES, _round_up(H, LANES))
    D_out_p = max(LANES, _round_up(D_out, LANES))

    f32 = jnp.float32
    w1_p = jnp.zeros((D_in, H_p), f32).at[:, :H].set(w1)
    b1_p = jnp.zeros((1, H_p), f32).at[:, :H].set(b1)
    wh_p = jnp.zeros((H_p, H_p), f32).at[:H, :H].set(wh)
    bh_p = jnp.zeros((1, H_p), f32).at[:, :H].set(bh)
    w2_p = jnp.zeros((H_p, D_out_p), f32).at[:H, :D_out].set(w2)
    b2_p = jnp.zeros((1, D_out_p), f32).at[:, :D_out].set(b2)
    return {"w1": w1_p, "b1": b1_p, "wh": wh_p, "bh": bh_p,
            "w2": w2_p, "b2": b2_p}


# ---------------------------------------------------------------------------
# Init + pure-JAX reference
# ---------------------------------------------------------------------------
def init_params(key, d_in, h, d_out):
    """Mirrors torch.nn.Linear default init (uniform +/- 1/sqrt(fan_in)).
    Weights stored as (in, out) for the kernel's x @ W convention."""
    ks = jax.random.split(key, 6)

    def lin(kw, kb, fan_in, fan_out):
        bound = 1.0 / jnp.sqrt(jnp.asarray(fan_in, jnp.float32))
        w = jax.random.uniform(kw, (fan_in, fan_out), jnp.float32, -bound, bound)
        b = jax.random.uniform(kb, (1, fan_out), jnp.float32, -bound, bound)
        return w, b

    w1, b1 = lin(ks[0], ks[1], d_in, h)
    wh, bh = lin(ks[2], ks[3], h, h)
    w2, b2 = lin(ks[4], ks[5], h, d_out)
    return {"w1": w1, "b1": b1, "wh": wh, "bh": bh, "w2": w2, "b2": b2}


def reference_forward(x, params):
    """Pure-JAX reference of the same forward pass (unpadded params)."""
    h = jnp.maximum(x @ params["w1"] + params["b1"], 0.0)
    for _ in range(C):
        h = jnp.maximum(h @ params["wh"] + params["bh"], 0.0)
    return h @ params["w2"] + params["b2"]


if __name__ == "__main__":
    # Small shapes consistent with the module: D_in -> H -> ... -> H -> D_out.
    B, D_in, H, D_out = 64, 32, 64, 4

    key = jax.random.PRNGKey(0)
    k_x, k_p = jax.random.split(key)
    x = jax.random.normal(k_x, (B, D_in), dtype=jnp.float32)
    params = init_params(k_p, D_in, H, D_out)
    prepped = prepare_params(params)   # one-time pad to lane-dense params

    # Chip-aware default tiling (1 tile on v5e/v6e, 2 on v7x).
    y = jax.block_until_ready(two_layer_net_forward(x, prepped, D_out))
    y_ref = reference_forward(x, params)
    assert y.shape == (B, D_out)
    assert jnp.allclose(y, y_ref, atol=1e-4, rtol=1e-4)

    # Explicit 2-tile path (exercises the multi-step "parallel" grid).
    y2 = jax.block_until_ready(
        two_layer_net_forward(x, prepped, D_out, num_tiles=2))
    assert jnp.allclose(y2, y_ref, atol=1e-4, rtol=1e-4)

    # Ragged small batch: exercises the batch-padding path.
    xs = x[:10]
    ys = jax.block_until_ready(two_layer_net_forward(xs, prepped, D_out))
    assert ys.shape == (10, D_out)
    assert jnp.allclose(ys, reference_forward(xs, params), atol=1e-4, rtol=1e-4)

    print("KERNEL_OK")
</pallas_src>

<mosaic_0001>
module attributes {stable_mosaic.version = 11 : i64} {
  func.func @two_layer_net_kernel(%arg0: i32, %arg1: memref<64x32xf32, #tpu.memory_space<vmem>>, %arg2: memref<32x128xf32, #tpu.memory_space<vmem>>, %arg3: memref<1x128xf32, #tpu.memory_space<vmem>>, %arg4: memref<128x128xf32, #tpu.memory_space<vmem>>, %arg5: memref<1x128xf32, #tpu.memory_space<vmem>>, %arg6: memref<128x128xf32, #tpu.memory_space<vmem>>, %arg7: memref<1x128xf32, #tpu.memory_space<vmem>>, %arg8: memref<64x128xf32, #tpu.memory_space<vmem>>) attributes {dimension_semantics = [#tpu.dimension_semantics<parallel>], iteration_bounds = array<i64: 1>, scalar_prefetch = 0 : i64, scratch_operands = 0 : i64, tpu.core_type = #tpu.core_type<tc>, window_params = [{transform_indices = @transform_0, window_bounds = array<i64: 64, 32>}, {pipeline_mode = #tpu.pipeline_mode<synchronous>, transform_indices = @transform_1, window_bounds = array<i64: 32, 128>}, {pipeline_mode = #tpu.pipeline_mode<synchronous>, transform_indices = @transform_2, window_bounds = array<i64: 1, 128>}, {pipeline_mode = #tpu.pipeline_mode<synchronous>, transform_indices = @transform_3, window_bounds = array<i64: 128, 128>}, {pipeline_mode = #tpu.pipeline_mode<synchronous>, transform_indices = @transform_4, window_bounds = array<i64: 1, 128>}, {pipeline_mode = #tpu.pipeline_mode<synchronous>, transform_indices = @transform_5, window_bounds = array<i64: 128, 128>}, {pipeline_mode = #tpu.pipeline_mode<synchronous>, transform_indices = @transform_6, window_bounds = array<i64: 1, 128>}, {transform_indices = @transform_7, window_bounds = array<i64: 64, 128>}]} {
    %c0 = arith.constant 0 : index
    %c0_0 = arith.constant 0 : index
    %0 = vector.load %arg3[%c0, %c0_0] : memref<1x128xf32, #tpu.memory_space<vmem>>, vector<1x128xf32>
    %c0_1 = arith.constant 0 : index
    %c0_2 = arith.constant 0 : index
    %1 = vector.load %arg5[%c0_1, %c0_2] : memref<1x128xf32, #tpu.memory_space<vmem>>, vector<1x128xf32>
    %c0_3 = arith.constant 0 : index
    %c0_4 = arith.constant 0 : index
    %2 = vector.load %arg7[%c0_3, %c0_4] : memref<1x128xf32, #tpu.memory_space<vmem>>, vector<1x128xf32>
    %c0_5 = arith.constant 0 : index
    %c0_6 = arith.constant 0 : index
    %3 = vector.load %arg4[%c0_5, %c0_6] : memref<128x128xf32, #tpu.memory_space<vmem>>, vector<128x128xf32>
    %c0_7 = arith.constant 0 : index
    %c0_8 = arith.constant 0 : index
    %4 = vector.load %arg1[%c0_7, %c0_8] : memref<64x32xf32, #tpu.memory_space<vmem>>, vector<64x32xf32>
    %c0_9 = arith.constant 0 : index
    %c0_10 = arith.constant 0 : index
    %5 = vector.load %arg2[%c0_9, %c0_10] : memref<32x128xf32, #tpu.memory_space<vmem>>, vector<32x128xf32>
    %cst = arith.constant dense<0.000000e+00> : vector<64x128xf32>
    %6 = tpu.matmul %4, %5, %cst {dimension_numbers = #tpu.dot_dimension_numbers<[1], [0], [0], [1], [0, 0, 1, 1], [], []>} : vector<64x32xf32>, vector<32x128xf32>, vector<64x128xf32> -> vector<64x128xf32>
    %7 = vector.broadcast %0 : vector<1x128xf32> to vector<64x128xf32>
    %8 = arith.addf %6, %7 : vector<64x128xf32>
    %cst_11 = arith.constant 0.000000e+00 : f32
    %9 = vector.broadcast %cst_11 : f32 to vector<64x128xf32>
    %10 = arith.maximumf %8, %9 : vector<64x128xf32>
    %c0_i32 = arith.constant 0 : i32
    %cst_12 = arith.constant dense<0.000000e+00> : vector<64x128xf32>
    %11 = tpu.matmul %10, %3, %cst_12 {dimension_numbers = #tpu.dot_dimension_numbers<[1], [0], [0], [1], [0, 0, 1, 1], [], []>} : vector<64x128xf32>, vector<128x128xf32>, vector<64x128xf32> -> vector<64x128xf32>
    %12 = vector.broadcast %1 : vector<1x128xf32> to vector<64x128xf32>
    %13 = arith.addf %11, %12 : vector<64x128xf32>
    %cst_13 = arith.constant 0.000000e+00 : f32
    %14 = vector.broadcast %cst_13 : f32 to vector<64x128xf32>
    %15 = arith.maximumf %13, %14 : vector<64x128xf32>
    %c1_i32 = arith.constant 1 : i32
    %cst_14 = arith.constant dense<0.000000e+00> : vector<64x128xf32>
    %16 = tpu.matmul %15, %3, %cst_14 {dimension_numbers = #tpu.dot_dimension_numbers<[1], [0], [0], [1], [0, 0, 1, 1], [], []>} : vector<64x128xf32>, vector<128x128xf32>, vector<64x128xf32> -> vector<64x128xf32>
    %17 = vector.broadcast %1 : vector<1x128xf32> to vector<64x128xf32>
    %18 = arith.addf %16, %17 : vector<64x128xf32>
    %cst_15 = arith.constant 0.000000e+00 : f32
    %19 = vector.broadcast %cst_15 : f32 to vector<64x128xf32>
    %20 = arith.maximumf %18, %19 : vector<64x128xf32>
    %c2_i32 = arith.constant 2 : i32
    %cst_16 = arith.constant dense<0.000000e+00> : vector<64x128xf32>
    %21 = tpu.matmul %20, %3, %cst_16 {dimension_numbers = #tpu.dot_dimension_numbers<[1], [0], [0], [1], [0, 0, 1, 1], [], []>} : vector<64x128xf32>, vector<128x128xf32>, vector<64x128xf32> -> vector<64x128xf32>
    %22 = vector.broadcast %1 : vector<1x128xf32> to vector<64x128xf32>
    %23 = arith.addf %21, %22 : vector<64x128xf32>
    %cst_17 = arith.constant 0.000000e+00 : f32
    %24 = vector.broadcast %cst_17 : f32 to vector<64x128xf32>
    %25 = arith.maximumf %23, %24 : vector<64x128xf32>
    %c3_i32 = arith.constant 3 : i32
    %cst_18 = arith.constant dense<0.000000e+00> : vector<64x128xf32>
    %26 = tpu.matmul %25, %3, %cst_18 {dimension_numbers = #tpu.dot_dimension_numbers<[1], [0], [0], [1], [0, 0, 1, 1], [], []>} : vector<64x128xf32>, vector<128x128xf32>, vector<64x128xf32> -> vector<64x128xf32>
    %27 = vector.broadcast %1 : vector<1x128xf32> to vector<64x128xf32>
    %28 = arith.addf %26, %27 : vector<64x128xf32>
    %cst_19 = arith.constant 0.000000e+00 : f32
    %29 = vector.broadcast %cst_19 : f32 to vector<64x128xf32>
    %30 = arith.maximumf %28, %29 : vector<64x128xf32>
    %c4_i32 = arith.constant 4 : i32
    %cst_20 = arith.constant dense<0.000000e+00> : vector<64x128xf32>
    %31 = tpu.matmul %30, %3, %cst_20 {dimension_numbers = #tpu.dot_dimension_numbers<[1], [0], [0], [1], [0, 0, 1, 1], [], []>} : vector<64x128xf32>, vector<128x128xf32>, vector<64x128xf32> -> vector<64x128xf32>
    %32 = vector.broadcast %1 : vector<1x128xf32> to vector<64x128xf32>
    %33 = arith.addf %31, %32 : vector<64x128xf32>
    %cst_21 = arith.constant 0.000000e+00 : f32
    %34 = vector.broadcast %cst_21 : f32 to vector<64x128xf32>
    %35 = arith.maximumf %33, %34 : vector<64x128xf32>
    %c5_i32 = arith.constant 5 : i32
    %cst_22 = arith.constant dense<0.000000e+00> : vector<64x128xf32>
    %36 = tpu.matmul %35, %3, %cst_22 {dimension_numbers = #tpu.dot_dimension_numbers<[1], [0], [0], [1], [0, 0, 1, 1], [], []>} : vector<64x128xf32>, vector<128x128xf32>, vector<64x128xf32> -> vector<64x128xf32>
    %37 = vector.broadcast %1 : vector<1x128xf32> to vector<64x128xf32>
    %38 = arith.addf %36, %37 : vector<64x128xf32>
    %cst_23 = arith.constant 0.000000e+00 : f32
    %39 = vector.broadcast %cst_23 : f32 to vector<64x128xf32>
    %40 = arith.maximumf %38, %39 : vector<64x128xf32>
    %c6_i32 = arith.constant 6 : i32
    %cst_24 = arith.constant dense<0.000000e+00> : vector<64x128xf32>
    %41 = tpu.matmul %40, %3, %cst_24 {dimension_numbers = #tpu.dot_dimension_numbers<[1], [0], [0], [1], [0, 0, 1, 1], [], []>} : vector<64x128xf32>, vector<128x128xf32>, vector<64x128xf32> -> vector<64x128xf32>
    %42 = vector.broadcast %1 : vector<1x128xf32> to vector<64x128xf32>
    %43 = arith.addf %41, %42 : vector<64x128xf32>
    %cst_25 = arith.constant 0.000000e+00 : f32
    %44 = vector.broadcast %cst_25 : f32 to vector<64x128xf32>
    %45 = arith.maximumf %43, %44 : vector<64x128xf32>
    %c7_i32 = arith.constant 7 : i32
    %cst_26 = arith.constant dense<0.000000e+00> : vector<64x128xf32>
    %46 = tpu.matmul %45, %3, %cst_26 {dimension_numbers = #tpu.dot_dimension_numbers<[1], [0], [0], [1], [0, 0, 1, 1], [], []>} : vector<64x128xf32>, vector<128x128xf32>, vector<64x128xf32> -> vector<64x128xf32>
    %47 = vector.broadcast %1 : vector<1x128xf32> to vector<64x128xf32>
    %48 = arith.addf %46, %47 : vector<64x128xf32>
    %cst_27 = arith.constant 0.000000e+00 : f32
    %49 = vector.broadcast %cst_27 : f32 to vector<64x128xf32>
    %50 = arith.maximumf %48, %49 : vector<64x128xf32>
    %c8_i32 = arith.constant 8 : i32
    %cst_28 = arith.constant dense<0.000000e+00> : vector<64x128xf32>
    %51 = tpu.matmul %50, %3, %cst_28 {dimension_numbers = #tpu.dot_dimension_numbers<[1], [0], [0], [1], [0, 0, 1, 1], [], []>} : vector<64x128xf32>, vector<128x128xf32>, vector<64x128xf32> -> vector<64x128xf32>
    %52 = vector.broadcast %1 : vector<1x128xf32> to vector<64x128xf32>
    %53 = arith.addf %51, %52 : vector<64x128xf32>
    %cst_29 = arith.constant 0.000000e+00 : f32
    %54 = vector.broadcast %cst_29 : f32 to vector<64x128xf32>
    %55 = arith.maximumf %53, %54 : vector<64x128xf32>
    %c9_i32 = arith.constant 9 : i32
    %cst_30 = arith.constant dense<0.000000e+00> : vector<64x128xf32>
    %56 = tpu.matmul %55, %3, %cst_30 {dimension_numbers = #tpu.dot_dimension_numbers<[1], [0], [0], [1], [0, 0, 1, 1], [], []>} : vector<64x128xf32>, vector<128x128xf32>, vector<64x128xf32> -> vector<64x128xf32>
    %57 = vector.broadcast %1 : vector<1x128xf32> to vector<64x128xf32>
    %58 = arith.addf %56, %57 : vector<64x128xf32>
    %cst_31 = arith.constant 0.000000e+00 : f32
    %59 = vector.broadcast %cst_31 : f32 to vector<64x128xf32>
    %60 = arith.maximumf %58, %59 : vector<64x128xf32>
    %c0_32 = arith.constant 0 : index
    %c0_33 = arith.constant 0 : index
    %61 = vector.load %arg6[%c0_32, %c0_33] : memref<128x128xf32, #tpu.memory_space<vmem>>, vector<128x128xf32>
    %cst_34 = arith.constant dense<0.000000e+00> : vector<64x128xf32>
    %62 = tpu.matmul %60, %61, %cst_34 {dimension_numbers = #tpu.dot_dimension_numbers<[1], [0], [0], [1], [0, 0, 1, 1], [], []>} : vector<64x128xf32>, vector<128x128xf32>, vector<64x128xf32> -> vector<64x128xf32>
    %63 = vector.broadcast %2 : vector<1x128xf32> to vector<64x128xf32>
    %64 = arith.addf %62, %63 : vector<64x128xf32>
    %c0_35 = arith.constant 0 : index
    %c0_36 = arith.constant 0 : index
    %65 = vector.load %arg8[%c0_35, %c0_36] : memref<64x128xf32, #tpu.memory_space<vmem>>, vector<64x128xf32>
    tpu.vector_store %arg8[%c0_35, %c0_36], %64 {strides = array<i32>} : memref<64x128xf32, #tpu.memory_space<vmem>>, vector<64x128xf32>,
    return
  }
  func.func @transform_0(%arg0: i32) -> (i32, i32) {
    %c0_i32 = arith.constant 0 : i32
    %c0_i32_0 = arith.constant 0 : i32
    return %arg0, %c0_i32 : i32, i32
  }
  func.func @transform_1(%arg0: i32) -> (i32, i32) {
    %c0_i32 = arith.constant 0 : i32
    %c0_i32_0 = arith.constant 0 : i32
    %c0_i32_1 = arith.constant 0 : i32
    return %c0_i32, %c0_i32_0 : i32, i32
  }
  func.func @transform_2(%arg0: i32) -> (i32, i32) {
    %c0_i32 = arith.constant 0 : i32
    %c0_i32_0 = arith.constant 0 : i32
    %c0_i32_1 = arith.constant 0 : i32
    return %c0_i32, %c0_i32_0 : i32, i32
  }
  func.func @transform_3(%arg0: i32) -> (i32, i32) {
    %c0_i32 = arith.constant 0 : i32
    %c0_i32_0 = arith.constant 0 : i32
    %c0_i32_1 = arith.constant 0 : i32
    return %c0_i32, %c0_i32_0 : i32, i32
  }
  func.func @transform_4(%arg0: i32) -> (i32, i32) {
    %c0_i32 = arith.constant 0 : i32
    %c0_i32_0 = arith.constant 0 : i32
    %c0_i32_1 = arith.constant 0 : i32
    return %c0_i32, %c0_i32_0 : i32, i32
  }
  func.func @transform_5(%arg0: i32) -> (i32, i32) {
    %c0_i32 = arith.constant 0 : i32
    %c0_i32_0 = arith.constant 0 : i32
    %c0_i32_1 = arith.constant 0 : i32
    return %c0_i32, %c0_i32_0 : i32, i32
  }
  func.func @transform_6(%arg0: i32) -> (i32, i32) {
    %c0_i32 = arith.constant 0 : i32
    %c0_i32_0 = arith.constant 0 : i32
    %c0_i32_1 = arith.constant 0 : i32
    return %c0_i32, %c0_i32_0 : i32, i32
  }
  func.func @transform_7(%arg0: i32) -> (i32, i32) {
    %c0_i32 = arith.constant 0 : i32
    %c0_i32_0 = arith.constant 0 : i32
    return %arg0, %c0_i32 : i32, i32
  }
}

</mosaic_0001>

<bundles_post_ra>
// kernel: _forward_jit.1
= control target key start
LH: loop header
LB: loop body
LE: loop exit
PB: predicated region body
PF: predicated region fallthrough
CT: control target
= control target key end

     0   :  { %12 = vsyncpa [#allocation3], 0  ;;  %s1211_s0 = inlined_call_operand.vmem [shape: f32[64,32], index: 0, kind: input, shape index: {}]   ;;  %s1212_s1 = inlined_call_operand.vmem [shape: f32[32,128], index: 1, kind: input, shape index: {}]   ;;  %s1213_s2 = inlined_call_operand.vmem [shape: f32[1,128], index: 2, kind: input, shape index: {}]   ;;  %s1214_s3 = inlined_call_operand.hbm [shape: f32[128,128], index: 3, kind: input, shape index: {}]   ;;  %s1215_s4 = inlined_call_operand.vmem [shape: f32[1,128], index: 4, kind: input, shape index: {}]   ;;  %s1216_s5 = inlined_call_operand.hbm [shape: f32[128,128], index: 5, kind: input, shape index: {}]   ;;  %s1217_s6 = inlined_call_operand.vmem [shape: f32[1,128], index: 6, kind: input, shape index: {}]   ;;  %s1218_s7 = inlined_call_operand.vmem [shape: f32[64,128], index: 7, kind: output, shape index: {}]  }
   0x1   :  { %s24_s26 = sshll.u32 %s1214_s3, 4  ;;  %s25_s26 = int_to_ptr.hbm [resolvable:$true] %s24_s26 }
   0x2   :  { %13 = vsyncpa [#allocation5], 0  ;;  %s800_s27 = smov [#allocation2]   ;;  %s39_s8 = sshll.u32 %s1216_s5, 4  ;;  %s40_s8 = int_to_ptr.hbm [resolvable:$true] %s39_s8 }
   0x3   :  { %s26_s28 = sshll.u32 %s800_s27, 4  ;;  %s801_s9 = smov 128   ;;  %s27_s28 = int_to_ptr.vmem [resolvable:$true] %s26_s28 }
   0x4   :  { %s802_s10 = smov 8   ;;  %s803_s11 = smov [#allocation4]  }
   0x5   :  { %32 = dma.hbm_to_vmem [thread:$0]  %s25_s26, 2048, %s27_s28, [#allocation3], %s801_s9, %s801_s9, %s802_s10  }
   0x6   :  { %s41_s12 = sshll.u32 %s803_s11, 4  ;;  %s42_s12 = int_to_ptr.vmem [resolvable:$true] %s41_s12 }
   0x7   :  { %47 = dma.hbm_to_vmem [thread:$0]  %s40_s8, 2048, %s42_s12, [#allocation5], %s801_s9, %s801_s9, %s802_s10  }
   0x8   :  { %796 = dma.done.wait [#allocation3], 2048  }
   0x9   :  { %797 = vsyncadd [#allocation3], 4294965248 }
   0xa   :  { %798 = dma.done.wait [#allocation5], 2048  }
   0xb   :  { %799 = vsyncadd [#allocation5], 4294965248  ;;  %v88_v0 = vld [vmem:[%s1212_s1 + $0x18] sm:$0xff]  ;;  %v87_v1 = vld [vmem:[%s1212_s1 + $0x10] sm:$0xff]  ;;  %vm92_vm0 = vcmask 261120  }
   0xc   :  { %129 = vmatpush.msra.mxu0 %v88_v0  ;;  %v86_v2 = vld [vmem:[%s1212_s1 + $0x8] sm:$0xff]  ;;  %v85_v3 = vld [vmem:[%s1212_s1] sm:$0xff]  ;;  %v79_v6 = vld [vmem:[%s1211_s0 + $0x10] sm:$0xff] }
   0xd   :  { %v77_v4 = vld [vmem:[%s1211_s0] sm:$0xff]  ;;  %v78_v5 = vld [vmem:[%s1211_s0 + $0x8] sm:$0xff]  ;;  %v80_v7 = vld [vmem:[%s1211_s0 + $0x18] sm:$0xff] }
   0xe   :  { %130 = vmatpush.msra.mxu0 %v87_v1  ;;  %v878_v8 = vld [vmem:[#allocation2 + $0x78] sm:$0xff]  ;;  %v880_v9 = vld [vmem:[#allocation2 + $0x70] sm:$0xff]  ;;  %v884_v10 = vld [vmem:[#allocation2 + $0x68] sm:$0xff] }
   0xf   :  { %169 = vmatpush.msra.mxu1 %v878_v8  ;;  %218 = vmatpush.msra.mxu2 %v878_v8  ;;  %v890_v11 = vld [vmem:[#allocation2 + $0x60] sm:$0xff]  ;;  %v899_v13 = vld [vmem:[#allocation2 + $0x58] sm:$0xff]  ;;  %v906_v14 = vld [vmem:[#allocation2 + $0x50] sm:$0xff] }
  0x10   :  { %131 = vmatpush.msra.mxu0 %v86_v2  ;;  %267 = vmatpush.msra.mxu3 %v878_v8  ;;  %v81_v12 = vld [vmem:[%s1211_s0 + $0x20] sm:$0xff]  ;;  %v911_v15 = vld [vmem:[#allocation2 + $0x48] sm:$0xff]  ;;  %v926_v18 = vld [vmem:[#allocation2 + $0x38] sm:$0xff] }
  0x11   :  { %170 = vmatpush.msra.mxu1 %v880_v9  ;;  %219 = vmatpush.msra.mxu2 %v880_v9  ;;  %v917_v16 = vld [vmem:[#allocation2 + $0x40] sm:$0xff]  ;;  %v82_v17 = vld [vmem:[%s1211_s0 + $0x28] sm:$0xff]  ;;  %v933_v19 = vld [vmem:[#allocation2 + $0x30] sm:$0xff] }
  0x12   :  { %132 = vmatpush.msra.mxu0 %v85_v3  ;;  %268 = vmatpush.msra.mxu3 %v880_v9  ;;  %v938_v20 = vld [vmem:[#allocation2 + $0x28] sm:$0xff]  ;;  %v944_v21 = vld [vmem:[#allocation2 + $0x20] sm:$0xff]  ;;  %v83_v22 = vld [vmem:[%s1211_s0 + $0x30] sm:$0xff] }
  0x13   :  { %733 = vmatmul.msk.f32.vlgmr.msra.gmra.mxu0 %vm92_vm0, %v77_v4  ;;  %171 = vmatpush.msra.mxu1 %v884_v10  ;;  %v953_v23 = vld [vmem:[#allocation2 + $0x18] sm:$0xff]  ;;  %v972_v25 = vld [vmem:[#allocation2 + $0x10] sm:$0xff]  ;;  %v976_v26 = vld [vmem:[#allocation2 + $0x8] sm:$0xff] }
  0x14   :  { %316 = vmatpush.msrb.mxu0 %v878_v8  ;;  %220 = vmatpush.msra.mxu2 %v884_v10  ;;  %v84_v24 = vld [vmem:[%s1211_s0 + $0x38] sm:$0xff]  ;;  %v982_v27 = vld [vmem:[#allocation2] sm:$0xff] }
  0x15   :  { %269 = vmatpush.msra.mxu3 %v884_v10  ;;  %172 = vmatpush.msra.mxu1 %v890_v11  ;;  %v1039_v28 = vld [vmem:[%s1213_s2] ss:$0 sm:$0xff] }
  0x16   :  { %317 = vmatpush.msrb.mxu0 %v880_v9  ;;  %221 = vmatpush.msra.mxu2 %v890_v11  ;;  %v1086_v53 = vld [vmem:[%s1215_s4] ss:$0 sm:$0xff] }
  0x17   :  { %270 = vmatpush.msra.mxu3 %v890_v11  ;;  %173 = vmatpush.msra.mxu1 %v899_v13 }
  0x18   :  { %318 = vmatpush.msrb.mxu0 %v884_v10  ;;  %222 = vmatpush.msra.mxu2 %v899_v13 }
  0x19   :  { %271 = vmatpush.msra.mxu3 %v899_v13  ;;  %174 = vmatpush.msra.mxu1 %v906_v14 }
  0x1a   :  { %319 = vmatpush.msrb.mxu0 %v890_v11  ;;  %223 = vmatpush.msra.mxu2 %v906_v14 }
  0x1b   :  { %734 = vmatmul.msk.f32.gmra.mxu0 %vm92_vm0, %v78_v5  ;;  %272 = vmatpush.msra.mxu3 %v906_v14 }
  0x1c   :  { %320 = vmatpush.msrb.mxu0 %v899_v13  ;;  %175 = vmatpush.msra.mxu1 %v911_v15 }
  0x1d   :  { %224 = vmatpush.msra.mxu2 %v911_v15  ;;  %273 = vmatpush.msra.mxu3 %v911_v15 }
  0x1e   :  { %321 = vmatpush.msrb.mxu0 %v906_v14  ;;  %176 = vmatpush.msra.mxu1 %v917_v16 }
  0x1f   :  { %225 = vmatpush.msra.mxu2 %v917_v16  ;;  %274 = vmatpush.msra.mxu3 %v917_v16 }
  0x20   :  { %177 = vmatpush.msra.mxu1 %v926_v18  ;;  %322 = vmatpush.msrb.mxu0 %v911_v15 }
  0x21   :  { %226 = vmatpush.msra.mxu2 %v926_v18  ;;  %275 = vmatpush.msra.mxu3 %v926_v18 }
  0x22   :  { %178 = vmatpush.msra.mxu1 %v933_v19  ;;  %323 = vmatpush.msrb.mxu0 %v917_v16 }
  0x23   :  { %735 = vmatmul.msk.f32.gmra.mxu0 %vm92_vm0, %v79_v6  ;;  %227 = vmatpush.msra.mxu2 %v933_v19 }
  0x24   :  { %276 = vmatpush.msra.mxu3 %v933_v19  ;;  %179 = vmatpush.msra.mxu1 %v938_v20 }
  0x25   :  { %228 = vmatpush.msra.mxu2 %v938_v20  ;;  %324 = vmatpush.msrb.mxu0 %v926_v18 }
  0x26   :  { %277 = vmatpush.msra.mxu3 %v938_v20  ;;  %180 = vmatpush.msra.mxu1 %v944_v21 }
  0x27   :  { %229 = vmatpush.msra.mxu2 %v944_v21  ;;  %325 = vmatpush.msrb.mxu0 %v933_v19 }
  0x28   :  { %278 = vmatpush.msra.mxu3 %v944_v21  ;;  %181 = vmatpush.msra.mxu1 %v953_v23 }
  0x29   :  { %230 = vmatpush.msra.mxu2 %v953_v23  ;;  %326 = vmatpush.msrb.mxu0 %v938_v20 }
  0x2a   :  { %279 = vmatpush.msra.mxu3 %v953_v23  ;;  %182 = vmatpush.msra.mxu1 %v972_v25 }
  0x2b   :  { %736 = vmatmul.msk.f32.gmra.mxu0 %vm92_vm0, %v80_v7  ;;  %231 = vmatpush.msra.mxu2 %v972_v25 }
  0x2c   :  { %327 = vmatpush.msrb.mxu0 %v944_v21  ;;  %280 = vmatpush.msra.mxu3 %v972_v25 }
  0x2d   :  { %183 = vmatpush.msra.mxu1 %v976_v26  ;;  %232 = vmatpush.msra.mxu2 %v976_v26 }
  0x2e   :  { %328 = vmatpush.msrb.mxu0 %v953_v23  ;;  %281 = vmatpush.msra.mxu3 %v976_v26 }
  0x2f   :  { %184 = vmatpush.msra.mxu1 %v982_v27  ;;  %233 = vmatpush.msra.mxu2 %v982_v27 }
  0x30   :  { %329 = vmatpush.msrb.mxu0 %v972_v25  ;;  %282 = vmatpush.msra.mxu3 %v982_v27 }
  0x31   :  { %365 = vmatpush.msrb.mxu1 %v878_v8  ;;  %414 = vmatpush.msrb.mxu2 %v878_v8 }
  0x32   :  { %330 = vmatpush.msrb.mxu0 %v976_v26  ;;  %463 = vmatpush.msrb.mxu3 %v878_v8 }
  0x33   :  { %737 = vmatmul.msk.f32.gmra.mxu0 %vm92_vm0, %v81_v12  ;;  %366 = vmatpush.msrb.mxu1 %v880_v9 }
  0x34   :  { %331 = vmatpush.msrb.mxu0 %v982_v27  ;;  %415 = vmatpush.msrb.mxu2 %v880_v9 }
  0x35   :  { %464 = vmatpush.msrb.mxu3 %v880_v9  ;;  %367 = vmatpush.msrb.mxu1 %v884_v10 }
  0x36   :  { %512 = vmatpush.msra.mxu0 %v878_v8  ;;  %416 = vmatpush.msrb.mxu2 %v884_v10 }
  0x37   :  { %465 = vmatpush.msrb.mxu3 %v884_v10  ;;  %368 = vmatpush.msrb.mxu1 %v890_v11 }
  0x38   :  { %513 = vmatpush.msra.mxu0 %v880_v9  ;;  %417 = vmatpush.msrb.mxu2 %v890_v11 }
  0x39   :  { %466 = vmatpush.msrb.mxu3 %v890_v11  ;;  %369 = vmatpush.msrb.mxu1 %v899_v13 }
  0x3a   :  { %514 = vmatpush.msra.mxu0 %v884_v10  ;;  %418 = vmatpush.msrb.mxu2 %v899_v13 }
  0x3b   :  { %738 = vmatmul.msk.f32.gmra.mxu0 %vm92_vm0, %v82_v17  ;;  %467 = vmatpush.msrb.mxu3 %v899_v13 }
  0x3c   :  { %515 = vmatpush.msra.mxu0 %v890_v11  ;;  %370 = vmatpush.msrb.mxu1 %v906_v14 }
  0x3d   :  { %419 = vmatpush.msrb.mxu2 %v906_v14  ;;  %468 = vmatpush.msrb.mxu3 %v906_v14 }
  0x3e   :  { %516 = vmatpush.msra.mxu0 %v899_v13  ;;  %371 = vmatpush.msrb.mxu1 %v911_v15 }
  0x3f   :  { %420 = vmatpush.msrb.mxu2 %v911_v15  ;;  %469 = vmatpush.msrb.mxu3 %v911_v15 }
  0x40   :  { %517 = vmatpush.msra.mxu0 %v906_v14  ;;  %372 = vmatpush.msrb.mxu1 %v917_v16 }
  0x41   :  { %421 = vmatpush.msrb.mxu2 %v917_v16  ;;  %470 = vmatpush.msrb.mxu3 %v917_v16 }
  0x42   :  { %518 = vmatpush.msra.mxu0 %v911_v15  ;;  %373 = vmatpush.msrb.mxu1 %v926_v18 }
  0x43   :  { %739 = vmatmul.msk.f32.gmra.mxu0 %vm92_vm0, %v83_v22  ;;  %422 = vmatpush.msrb.mxu2 %v926_v18 }
  0x44   :  { %519 = vmatpush.msra.mxu0 %v917_v16  ;;  %471 = vmatpush.msrb.mxu3 %v926_v18 }
  0x45   :  { %374 = vmatpush.msrb.mxu1 %v933_v19  ;;  %423 = vmatpush.msrb.mxu2 %v933_v19 }
  0x46   :  { %520 = vmatpush.msra.mxu0 %v926_v18  ;;  %472 = vmatpush.msrb.mxu3 %v933_v19 }
  0x47   :  { %375 = vmatpush.msrb.mxu1 %v938_v20  ;;  %424 = vmatpush.msrb.mxu2 %v938_v20 }
  0x48   :  { %521 = vmatpush.msra.mxu0 %v933_v19  ;;  %473 = vmatpush.msrb.mxu3 %v938_v20 }
  0x49   :  { %376 = vmatpush.msrb.mxu1 %v944_v21  ;;  %425 = vmatpush.msrb.mxu2 %v944_v21 }
  0x4a   :  { %522 = vmatpush.msra.mxu0 %v938_v20  ;;  %474 = vmatpush.msrb.mxu3 %v944_v21 }
  0x4b   :  { %740 = vmatmul.msk.f32.gmra.mxu0 %vm92_vm0, %v84_v24  ;;  %377 = vmatpush.msrb.mxu1 %v953_v23 }
  0x4c   :  { %523 = vmatpush.msra.mxu0 %v944_v21  ;;  %426 = vmatpush.msrb.mxu2 %v953_v23 }
  0x4d   :  { %475 = vmatpush.msrb.mxu3 %v953_v23  ;;  %378 = vmatpush.msrb.mxu1 %v972_v25 }
  0x4e   :  { %524 = vmatpush.msra.mxu0 %v953_v23  ;;  %427 = vmatpush.msrb.mxu2 %v972_v25 }
  0x4f   :  { %476 = vmatpush.msrb.mxu3 %v972_v25  ;;  %379 = vmatpush.msrb.mxu1 %v976_v26 }
  0x50   :  { %525 = vmatpush.msra.mxu0 %v972_v25  ;;  %428 = vmatpush.msrb.mxu2 %v976_v26 }
  0x51   :  { %477 = vmatpush.msrb.mxu3 %v976_v26  ;;  %380 = vmatpush.msrb.mxu1 %v982_v27 }
  0x52   :  { %526 = vmatpush.msra.mxu0 %v976_v26  ;;  %429 = vmatpush.msrb.mxu2 %v982_v27 }
  0x53   :  { %478 = vmatpush.msrb.mxu3 %v982_v27 }
  0x54   :  { %527 = vmatpush.msra.mxu0 %v982_v27 }
  0x90   :  { %v134_v29 = vpop.f32.mrf.mxu0 }
  0x91   :  { %v135_v30 = vadd.f32 %v1039_v28, %v134_v29 }
  0x93   :  { %v158_v31 = vmax.f32 %v135_v30, 0.0 }
  0x95   :  { %185 = vmatmul.f32.vlgmr.msra.gmra.mxu1 %v158_v31 }
  0x96   :  { %561 = vmatpush.msra.mxu1 %v878_v8 }
  0x98   :  { %v137_v32 = vpop.f32.mrf.mxu0  ;;  %562 = vmatpush.msra.mxu1 %v880_v9 }
  0x99   :  { %v138_v33 = vadd.f32 %v1039_v28, %v137_v32 }
  0x9a   :  { %563 = vmatpush.msra.mxu1 %v884_v10 }
  0x9b   :  { %v159_v34 = vmax.f32 %v138_v33, 0.0 }
  0x9c   :  { %564 = vmatpush.msra.mxu1 %v890_v11 }
  0x9d   :  { %188 = vmatmul.f32.gmra.mxu1 %v159_v34 }
  0x9e   :  { %565 = vmatpush.msra.mxu1 %v899_v13 }
  0xa0   :  { %v140_v35 = vpop.f32.mrf.mxu0  ;;  %566 = vmatpush.msra.mxu1 %v906_v14 }
  0xa1   :  { %v141_v36 = vadd.f32 %v1039_v28, %v140_v35 }
  0xa2   :  { %567 = vmatpush.msra.mxu1 %v911_v15 }
  0xa3   :  { %v160_v37 = vmax.f32 %v141_v36, 0.0 }
  0xa4   :  { %568 = vmatpush.msra.mxu1 %v917_v16 }
  0xa5   :  { %191 = vmatmul.f32.gmra.mxu1 %v160_v37 }
  0xa6   :  { %569 = vmatpush.msra.mxu1 %v926_v18 }
  0xa8   :  { %v143_v38 = vpop.f32.mrf.mxu0  ;;  %570 = vmatpush.msra.mxu1 %v933_v19 }
  0xa9   :  { %v144_v39 = vadd.f32 %v1039_v28, %v143_v38 }
  0xaa   :  { %571 = vmatpush.msra.mxu1 %v938_v20 }
  0xab   :  { %v161_v40 = vmax.f32 %v144_v39, 0.0 }
  0xac   :  { %572 = vmatpush.msra.mxu1 %v944_v21 }
  0xad   :  { %194 = vmatmul.f32.gmra.mxu1 %v161_v40 }
  0xae   :  { %573 = vmatpush.msra.mxu1 %v953_v23 }
  0xb0   :  { %v146_v41 = vpop.f32.mrf.mxu0  ;;  %574 = vmatpush.msra.mxu1 %v972_v25 }
  0xb1   :  { %v147_v42 = vadd.f32 %v1039_v28, %v146_v41 }
  0xb2   :  { %575 = vmatpush.msra.mxu1 %v976_v26 }
  0xb3   :  { %v162_v43 = vmax.f32 %v147_v42, 0.0 }
  0xb4   :  { %576 = vmatpush.msra.mxu1 %v982_v27 }
  0xb5   :  { %197 = vmatmul.f32.gmra.mxu1 %v162_v43 }
  0xb8   :  { %v149_v44 = vpop.f32.mrf.mxu0 }
  0xb9   :  { %v150_v45 = vadd.f32 %v1039_v28, %v149_v44 }
  0xbb   :  { %v163_v46 = vmax.f32 %v150_v45, 0.0 }
  0xbd   :  { %200 = vmatmul.f32.gmra.mxu1 %v163_v46 }
  0xc0   :  { %v152_v47 = vpop.f32.mrf.mxu0 }
  0xc1   :  { %v153_v48 = vadd.f32 %v1039_v28, %v152_v47 }
  0xc3   :  { %v164_v49 = vmax.f32 %v153_v48, 0.0 }
  0xc5   :  { %203 = vmatmul.f32.gmra.mxu1 %v164_v49 }
  0xc8   :  { %v155_v50 = vpop.f32.mrf.mxu0 }
  0xc9   :  { %v156_v51 = vadd.f32 %v1039_v28, %v155_v50 }
  0xcb   :  { %v165_v52 = vmax.f32 %v156_v51, 0.0 }
  0xcd   :  { %206 = vmatmul.f32.gmra.mxu1 %v165_v52 }
 0x112   :  { %v186_v54 = vpop.f32.mrf.mxu1 }
 0x113   :  { %v187_v55 = vadd.f32 %v1086_v53, %v186_v54 }
 0x115   :  { %v210_v56 = vmax.f32 %v187_v55, 0.0 }
 0x117   :  { %234 = vmatmul.f32.vlgmr.msra.gmra.mxu2 %v210_v56 }
 0x118   :  { %610 = vmatpush.msra.mxu2 %v878_v8 }
 0x11a   :  { %v189_v57 = vpop.f32.mrf.mxu1  ;;  %611 = vmatpush.msra.mxu2 %v880_v9 }
 0x11b   :  { %v190_v58 = vadd.f32 %v1086_v53, %v189_v57 }
 0x11c   :  { %612 = vmatpush.msra.mxu2 %v884_v10 }
 0x11d   :  { %v211_v59 = vmax.f32 %v190_v58, 0.0 }
 0x11e   :  { %613 = vmatpush.msra.mxu2 %v890_v11 }
 0x11f   :  { %237 = vmatmul.f32.gmra.mxu2 %v211_v59 }
 0x120   :  { %614 = vmatpush.msra.mxu2 %v899_v13 }
 0x122   :  { %v192_v60 = vpop.f32.mrf.mxu1  ;;  %615 = vmatpush.msra.mxu2 %v906_v14 }
 0x123   :  { %v193_v61 = vadd.f32 %v1086_v53, %v192_v60 }
 0x124   :  { %616 = vmatpush.msra.mxu2 %v911_v15 }
 0x125   :  { %v212_v62 = vmax.f32 %v193_v61, 0.0 }
 0x126   :  { %617 = vmatpush.msra.mxu2 %v917_v16 }
 0x127   :  { %240 = vmatmul.f32.gmra.mxu2 %v212_v62 }
 0x128   :  { %618 = vmatpush.msra.mxu2 %v926_v18 }
 0x12a   :  { %v195_v63 = vpop.f32.mrf.mxu1  ;;  %619 = vmatpush.msra.mxu2 %v933_v19 }
 0x12b   :  { %v196_v0 = vadd.f32 %v1086_v53, %v195_v63 }
 0x12c   :  { %620 = vmatpush.msra.mxu2 %v938_v20 }
 0x12d   :  { %v213_v1 = vmax.f32 %v196_v0, 0.0 }
 0x12e   :  { %621 = vmatpush.msra.mxu2 %v944_v21 }
 0x12f   :  { %243 = vmatmul.f32.gmra.mxu2 %v213_v1 }
 0x130   :  { %622 = vmatpush.msra.mxu2 %v953_v23 }
 0x132   :  { %v198_v2 = vpop.f32.mrf.mxu1  ;;  %623 = vmatpush.msra.mxu2 %v972_v25 }
 0x133   :  { %v199_v3 = vadd.f32 %v1086_v53, %v198_v2 }
 0x134   :  { %624 = vmatpush.msra.mxu2 %v976_v26 }
 0x135   :  { %v214_v4 = vmax.f32 %v199_v3, 0.0 }
 0x136   :  { %625 = vmatpush.msra.mxu2 %v982_v27 }
 0x137   :  { %246 = vmatmul.f32.gmra.mxu2 %v214_v4 }
 0x13a   :  { %v201_v5 = vpop.f32.mrf.mxu1 }
 0x13b   :  { %v202_v6 = vadd.f32 %v1086_v53, %v201_v5 }
 0x13d   :  { %v215_v7 = vmax.f32 %v202_v6, 0.0 }
 0x13f   :  { %249 = vmatmul.f32.gmra.mxu2 %v215_v7 }
 0x142   :  { %v204_v8 = vpop.f32.mrf.mxu1 }
 0x143   :  { %v205_v9 = vadd.f32 %v1086_v53, %v204_v8 }
 0x145   :  { %v216_v10 = vmax.f32 %v205_v9, 0.0 }
 0x147   :  { %252 = vmatmul.f32.gmra.mxu2 %v216_v10 }
 0x14a   :  { %v207_v11 = vpop.f32.mrf.mxu1 }
 0x14b   :  { %v208_v12 = vadd.f32 %v1086_v53, %v207_v11 }
 0x14d   :  { %v217_v13 = vmax.f32 %v208_v12, 0.0 }
 0x14f   :  { %255 = vmatmul.f32.gmra.mxu2 %v217_v13 }
 0x19a   :  { %v235_v14 = vpop.f32.mrf.mxu2 }
 0x19b   :  { %v236_v15 = vadd.f32 %v1086_v53, %v235_v14 }
 0x19d   :  { %v259_v16 = vmax.f32 %v236_v15, 0.0 }
 0x19f   :  { %283 = vmatmul.f32.vlgmr.msra.gmra.mxu3 %v259_v16 }
 0x1a2   :  { %v238_v17 = vpop.f32.mrf.mxu2 }
 0x1a3   :  { %v239_v18 = vadd.f32 %v1086_v53, %v238_v17 }
 0x1a5   :  { %v260_v19 = vmax.f32 %v239_v18, 0.0 }
 0x1a7   :  { %286 = vmatmul.f32.gmra.mxu3 %v260_v19 }
 0x1aa   :  { %v241_v20 = vpop.f32.mrf.mxu2 }
 0x1ab   :  { %v242_v21 = vadd.f32 %v1086_v53, %v241_v20 }
 0x1ad   :  { %v261_v22 = vmax.f32 %v242_v21, 0.0 }
 0x1af   :  { %289 = vmatmul.f32.gmra.mxu3 %v261_v22 }
 0x1b2   :  { %v244_v23 = vpop.f32.mrf.mxu2 }
 0x1b3   :  { %v245_v24 = vadd.f32 %v1086_v53, %v244_v23 }
 0x1b5   :  { %v262_v25 = vmax.f32 %v245_v24, 0.0 }
 0x1b7   :  { %292 = vmatmul.f32.gmra.mxu3 %v262_v25 }
 0x1ba   :  { %v247_v26 = vpop.f32.mrf.mxu2 }
 0x1bb   :  { %v248_v27 = vadd.f32 %v1086_v53, %v247_v26 }
 0x1bd   :  { %v263_v28 = vmax.f32 %v248_v27, 0.0 }
 0x1bf   :  { %295 = vmatmul.f32.gmra.mxu3 %v263_v28 }
 0x1c2   :  { %v250_v29 = vpop.f32.mrf.mxu2 }
 0x1c3   :  { %v251_v30 = vadd.f32 %v1086_v53, %v250_v29 }
 0x1c5   :  { %v264_v31 = vmax.f32 %v251_v30, 0.0 }
 0x1c7   :  { %298 = vmatmul.f32.gmra.mxu3 %v264_v31 }
 0x1ca   :  { %v253_v32 = vpop.f32.mrf.mxu2 }
 0x1cb   :  { %v254_v33 = vadd.f32 %v1086_v53, %v253_v32 }
 0x1cd   :  { %v265_v34 = vmax.f32 %v254_v33, 0.0 }
 0x1cf   :  { %301 = vmatmul.f32.gmra.mxu3 %v265_v34 }
 0x1d2   :  { %v256_v35 = vpop.f32.mrf.mxu2 }
 0x1d3   :  { %v257_v36 = vadd.f32 %v1086_v53, %v256_v35 }
 0x1d5   :  { %v266_v37 = vmax.f32 %v257_v36, 0.0 }
 0x1d7   :  { %304 = vmatmul.f32.gmra.mxu3 %v266_v37 }
 0x222   :  { %v284_v38 = vpop.f32.mrf.mxu3 }
 0x223   :  { %v285_v39 = vadd.f32 %v1086_v53, %v284_v38 }
 0x225   :  { %v308_v40 = vmax.f32 %v285_v39, 0.0 }
 0x227   :  { %332 = vmatmul.f32.vlgmr.msrb.gmra.mxu0 %v308_v40 }
 0x22a   :  { %v287_v41 = vpop.f32.mrf.mxu3 }
 0x22b   :  { %v288_v42 = vadd.f32 %v1086_v53, %v287_v41 }
 0x22d   :  { %v309_v43 = vmax.f32 %v288_v42, 0.0 }
 0x22f   :  { %335 = vmatmul.f32.gmra.mxu0 %v309_v43 }
 0x232   :  { %v290_v44 = vpop.f32.mrf.mxu3 }
 0x233   :  { %v291_v45 = vadd.f32 %v1086_v53, %v290_v44 }
 0x235   :  { %v310_v46 = vmax.f32 %v291_v45, 0.0 }
 0x237   :  { %338 = vmatmul.f32.gmra.mxu0 %v310_v46 }
 0x23a   :  { %v293_v47 = vpop.f32.mrf.mxu3 }
 0x23b   :  { %v294_v48 = vadd.f32 %v1086_v53, %v293_v47 }
 0x23d   :  { %v311_v49 = vmax.f32 %v294_v48, 0.0 }
 0x23f   :  { %341 = vmatmul.f32.gmra.mxu0 %v311_v49 }
 0x242   :  { %v296_v50 = vpop.f32.mrf.mxu3 }
 0x243   :  { %v297_v51 = vadd.f32 %v1086_v53, %v296_v50 }
 0x245   :  { %v312_v52 = vmax.f32 %v297_v51, 0.0 }
 0x247   :  { %344 = vmatmul.f32.gmra.mxu0 %v312_v52 }
 0x24a   :  { %v299_v54 = vpop.f32.mrf.mxu3 }
 0x24b   :  { %v300_v55 = vadd.f32 %v1086_v53, %v299_v54 }
 0x24d   :  { %v313_v56 = vmax.f32 %v300_v55, 0.0 }
 0x24f   :  { %347 = vmatmul.f32.gmra.mxu0 %v313_v56 }
 0x252   :  { %v302_v57 = vpop.f32.mrf.mxu3 }
 0x253   :  { %v303_v58 = vadd.f32 %v1086_v53, %v302_v57 }
 0x255   :  { %v314_v59 = vmax.f32 %v303_v58, 0.0 }
 0x257   :  { %350 = vmatmul.f32.gmra.mxu0 %v314_v59 }
 0x25a   :  { %v305_v60 = vpop.f32.mrf.mxu3 }
 0x25b   :  { %v306_v61 = vadd.f32 %v1086_v53, %v305_v60 }
 0x25d   :  { %v315_v62 = vmax.f32 %v306_v61, 0.0 }
 0x25f   :  { %353 = vmatmul.f32.gmra.mxu0 %v315_v62 }
 0x2a4   :  { %v333_v63 = vpop.f32.mrf.mxu0 }
 0x2a5   :  { %v334_v0 = vadd.f32 %v1086_v53, %v333_v63 }
 0x2a7   :  { %v357_v1 = vmax.f32 %v334_v0, 0.0 }
 0x2a9   :  { %381 = vmatmul.f32.vlgmr.msrb.gmra.mxu1 %v357_v1 }
 0x2ac   :  { %v336_v2 = vpop.f32.mrf.mxu0 }
 0x2ad   :  { %v337_v3 = vadd.f32 %v1086_v53, %v336_v2 }
 0x2af   :  { %v358_v4 = vmax.f32 %v337_v3, 0.0 }
 0x2b1   :  { %384 = vmatmul.f32.gmra.mxu1 %v358_v4 }
 0x2b4   :  { %v339_v5 = vpop.f32.mrf.mxu0 }
 0x2b5   :  { %v340_v6 = vadd.f32 %v1086_v53, %v339_v5 }
 0x2b7   :  { %v359_v7 = vmax.f32 %v340_v6, 0.0 }
 0x2b9   :  { %387 = vmatmul.f32.gmra.mxu1 %v359_v7 }
 0x2bc   :  { %v342_v8 = vpop.f32.mrf.mxu0 }
 0x2bd   :  { %v343_v9 = vadd.f32 %v1086_v53, %v342_v8 }
 0x2bf   :  { %v360_v10 = vmax.f32 %v343_v9, 0.0 }
 0x2c1   :  { %390 = vmatmul.f32.gmra.mxu1 %v360_v10 }
 0x2c4   :  { %v345_v11 = vpop.f32.mrf.mxu0 }
 0x2c5   :  { %v346_v12 = vadd.f32 %v1086_v53, %v345_v11 }
 0x2c7   :  { %v361_v13 = vmax.f32 %v346_v12, 0.0 }
 0x2c9   :  { %393 = vmatmul.f32.gmra.mxu1 %v361_v13 }
 0x2cc   :  { %v348_v14 = vpop.f32.mrf.mxu0 }
 0x2cd   :  { %v349_v15 = vadd.f32 %v1086_v53, %v348_v14 }
 0x2cf   :  { %v362_v16 = vmax.f32 %v349_v15, 0.0 }
 0x2d1   :  { %396 = vmatmul.f32.gmra.mxu1 %v362_v16 }
 0x2d4   :  { %v351_v17 = vpop.f32.mrf.mxu0 }
 0x2d5   :  { %v352_v18 = vadd.f32 %v1086_v53, %v351_v17 }
 0x2d7   :  { %v363_v19 = vmax.f32 %v352_v18, 0.0 }
 0x2d9   :  { %399 = vmatmul.f32.gmra.mxu1 %v363_v19 }
 0x2dc   :  { %v354_v20 = vpop.f32.mrf.mxu0 }
 0x2dd   :  { %v355_v21 = vadd.f32 %v1086_v53, %v354_v20 }
 0x2df   :  { %v364_v22 = vmax.f32 %v355_v21, 0.0 }
 0x2e1   :  { %402 = vmatmul.f32.gmra.mxu1 %v364_v22 }
 0x326   :  { %v382_v23 = vpop.f32.mrf.mxu1 }
 0x327   :  { %v383_v24 = vadd.f32 %v1086_v53, %v382_v23 }
 0x329   :  { %v406_v25 = vmax.f32 %v383_v24, 0.0 }
 0x32b   :  { %430 = vmatmul.f32.vlgmr.msrb.gmra.mxu2 %v406_v25 }
 0x32e   :  { %v385_v26 = vpop.f32.mrf.mxu1 }
 0x32f   :  { %v386_v27 = vadd.f32 %v1086_v53, %v385_v26 }
 0x331   :  { %v407_v28 = vmax.f32 %v386_v27, 0.0 }
 0x333   :  { %433 = vmatmul.f32.gmra.mxu2 %v407_v28 }
 0x336   :  { %v388_v29 = vpop.f32.mrf.mxu1 }
 0x337   :  { %v389_v30 = vadd.f32 %v1086_v53, %v388_v29 }
 0x339   :  { %v408_v31 = vmax.f32 %v389_v30, 0.0 }
 0x33b   :  { %436 = vmatmul.f32.gmra.mxu2 %v408_v31 }
 0x33e   :  { %v391_v32 = vpop.f32.mrf.mxu1 }
 0x33f   :  { %v392_v33 = vadd.f32 %v1086_v53, %v391_v32 }
 0x341   :  { %v409_v34 = vmax.f32 %v392_v33, 0.0 }
 0x343   :  { %439 = vmatmul.f32.gmra.mxu2 %v409_v34 }
 0x346   :  { %v394_v35 = vpop.f32.mrf.mxu1 }
 0x347   :  { %v395_v36 = vadd.f32 %v1086_v53, %v394_v35 }
 0x349   :  { %v410_v37 = vmax.f32 %v395_v36, 0.0 }
 0x34b   :  { %442 = vmatmul.f32.gmra.mxu2 %v410_v37 }
 0x34e   :  { %v397_v38 = vpop.f32.mrf.mxu1 }
 0x34f   :  { %v398_v39 = vadd.f32 %v1086_v53, %v397_v38 }
 0x351   :  { %v411_v40 = vmax.f32 %v398_v39, 0.0 }
 0x353   :  { %445 = vmatmul.f32.gmra.mxu2 %v411_v40 }
 0x356   :  { %v400_v41 = vpop.f32.mrf.mxu1 }
 0x357   :  { %v401_v42 = vadd.f32 %v1086_v53, %v400_v41 }
 0x359   :  { %v412_v43 = vmax.f32 %v401_v42, 0.0 }
 0x35b   :  { %448 = vmatmul.f32.gmra.mxu2 %v412_v43 }
 0x35e   :  { %v403_v44 = vpop.f32.mrf.mxu1 }
 0x35f   :  { %v404_v45 = vadd.f32 %v1086_v53, %v403_v44 }
 0x361   :  { %v413_v46 = vmax.f32 %v404_v45, 0.0 }
 0x363   :  { %451 = vmatmul.f32.gmra.mxu2 %v413_v46 }
 0x3ae   :  { %v431_v47 = vpop.f32.mrf.mxu2 }
 0x3af   :  { %v432_v48 = vadd.f32 %v1086_v53, %v431_v47 }
 0x3b1   :  { %v455_v49 = vmax.f32 %v432_v48, 0.0 }
 0x3b3   :  { %479 = vmatmul.f32.vlgmr.msrb.gmra.mxu3 %v455_v49 }
 0x3b6   :  { %v434_v50 = vpop.f32.mrf.mxu2 }
 0x3b7   :  { %v435_v51 = vadd.f32 %v1086_v53, %v434_v50 }
 0x3b9   :  { %v456_v52 = vmax.f32 %v435_v51, 0.0 }
 0x3bb   :  { %482 = vmatmul.f32.gmra.mxu3 %v456_v52 }
 0x3be   :  { %v437_v54 = vpop.f32.mrf.mxu2 }
 0x3bf   :  { %v438_v55 = vadd.f32 %v1086_v53, %v437_v54 }
 0x3c1   :  { %v457_v56 = vmax.f32 %v438_v55, 0.0 }
 0x3c3   :  { %485 = vmatmul.f32.gmra.mxu3 %v457_v56 }
 0x3c6   :  { %v440_v57 = vpop.f32.mrf.mxu2 }
 0x3c7   :  { %v441_v58 = vadd.f32 %v1086_v53, %v440_v57 }
 0x3c9   :  { %v458_v59 = vmax.f32 %v441_v58, 0.0 }
 0x3cb   :  { %488 = vmatmul.f32.gmra.mxu3 %v458_v59 }
 0x3ce   :  { %v443_v60 = vpop.f32.mrf.mxu2 }
 0x3cf   :  { %v444_v61 = vadd.f32 %v1086_v53, %v443_v60 }
 0x3d1   :  { %v459_v62 = vmax.f32 %v444_v61, 0.0 }
 0x3d3   :  { %491 = vmatmul.f32.gmra.mxu3 %v459_v62 }
 0x3d6   :  { %v446_v63 = vpop.f32.mrf.mxu2 }
 0x3d7   :  { %v447_v0 = vadd.f32 %v1086_v53, %v446_v63 }
 0x3d9   :  { %v460_v1 = vmax.f32 %v447_v0, 0.0 }
 0x3db   :  { %494 = vmatmul.f32.gmra.mxu3 %v460_v1 }
 0x3de   :  { %v449_v2 = vpop.f32.mrf.mxu2 }
 0x3df   :  { %v450_v3 = vadd.f32 %v1086_v53, %v449_v2 }
 0x3e1   :  { %v461_v4 = vmax.f32 %v450_v3, 0.0 }
 0x3e3   :  { %497 = vmatmul.f32.gmra.mxu3 %v461_v4 }
 0x3e6   :  { %v452_v5 = vpop.f32.mrf.mxu2 }
 0x3e7   :  { %v453_v6 = vadd.f32 %v1086_v53, %v452_v5  ;;  %v674_v5 = vld [vmem:[#allocation4 + $0x78] sm:$0xff] }
 0x3e8   :  { %678 = vmatpush.msra.mxu3 %v674_v5 }
 0x3e9   :  { %v462_v7 = vmax.f32 %v453_v6, 0.0  ;;  %v673_v6 = vld [vmem:[#allocation4 + $0x70] sm:$0xff] }
 0x3ea   :  { %679 = vmatpush.msra.mxu3 %v673_v6 }
 0x3eb   :  { %500 = vmatmul.f32.gmra.mxu3 %v462_v7  ;;  %v672_v7 = vld [vmem:[#allocation4 + $0x68] sm:$0xff] }
 0x3ec   :  { %680 = vmatpush.msra.mxu3 %v672_v7 }
 0x436   :  { %v480_v8 = vpop.f32.mrf.mxu3 }
 0x437   :  { %v481_v9 = vadd.f32 %v1086_v53, %v480_v8 }
 0x439   :  { %v504_v10 = vmax.f32 %v481_v9, 0.0 }
 0x43b   :  { %528 = vmatmul.f32.vlgmr.msra.gmra.mxu0 %v504_v10  ;;  %v671_v10 = vld [vmem:[#allocation4 + $0x60] sm:$0xff] }
 0x43c   :  { %681 = vmatpush.msra.mxu3 %v671_v10 }
 0x43e   :  { %v483_v11 = vpop.f32.mrf.mxu3 }
 0x43f   :  { %v484_v12 = vadd.f32 %v1086_v53, %v483_v11 }
 0x441   :  { %v505_v13 = vmax.f32 %v484_v12, 0.0  ;;  %v670_v12 = vld [vmem:[#allocation4 + $0x58] sm:$0xff] }
 0x442   :  { %682 = vmatpush.msra.mxu3 %v670_v12 }
 0x443   :  { %531 = vmatmul.f32.gmra.mxu0 %v505_v13  ;;  %v669_v13 = vld [vmem:[#allocation4 + $0x50] sm:$0xff] }
 0x444   :  { %683 = vmatpush.msra.mxu3 %v669_v13 }
 0x446   :  { %v486_v14 = vpop.f32.mrf.mxu3 }
 0x447   :  { %v487_v15 = vadd.f32 %v1086_v53, %v486_v14  ;;  %v668_v14 = vld [vmem:[#allocation4 + $0x48] sm:$0xff] }
 0x448   :  { %684 = vmatpush.msra.mxu3 %v668_v14 }
 0x449   :  { %v506_v16 = vmax.f32 %v487_v15, 0.0 }
 0x44b   :  { %534 = vmatmul.f32.gmra.mxu0 %v506_v16 }
 0x44e   :  { %v489_v17 = vpop.f32.mrf.mxu3 }
 0x44f   :  { %v490_v18 = vadd.f32 %v1086_v53, %v489_v17  ;;  %v667_v17 = vld [vmem:[#allocation4 + $0x40] sm:$0xff] }
 0x450   :  { %685 = vmatpush.msra.mxu3 %v667_v17 }
 0x451   :  { %v507_v19 = vmax.f32 %v490_v18, 0.0 }
 0x453   :  { %537 = vmatmul.f32.gmra.mxu0 %v507_v19  ;;  %v666_v19 = vld [vmem:[#allocation4 + $0x38] sm:$0xff] }
 0x454   :  { %686 = vmatpush.msra.mxu3 %v666_v19 }
 0x456   :  { %v492_v20 = vpop.f32.mrf.mxu3 }
 0x457   :  { %v493_v21 = vadd.f32 %v1086_v53, %v492_v20  ;;  %v665_v20 = vld [vmem:[#allocation4 + $0x30] sm:$0xff] }
 0x458   :  { %687 = vmatpush.msra.mxu3 %v665_v20 }
 0x459   :  { %v508_v22 = vmax.f32 %v493_v21, 0.0  ;;  %v664_v21 = vld [vmem:[#allocation4 + $0x28] sm:$0xff] }
 0x45a   :  { %688 = vmatpush.msra.mxu3 %v664_v21 }
 0x45b   :  { %540 = vmatmul.f32.gmra.mxu0 %v508_v22 }
 0x45e   :  { %v495_v23 = vpop.f32.mrf.mxu3 }
 0x45f   :  { %v496_v24 = vadd.f32 %v1086_v53, %v495_v23 }
 0x461   :  { %v509_v25 = vmax.f32 %v496_v24, 0.0  ;;  %v663_v24 = vld [vmem:[#allocation4 + $0x20] sm:$0xff] }
 0x462   :  { %689 = vmatpush.msra.mxu3 %v663_v24 }
 0x463   :  { %543 = vmatmul.f32.gmra.mxu0 %v509_v25 }
 0x466   :  { %v498_v26 = vpop.f32.mrf.mxu3 }
 0x467   :  { %v499_v27 = vadd.f32 %v1086_v53, %v498_v26  ;;  %v662_v26 = vld [vmem:[#allocation4 + $0x18] sm:$0xff] }
 0x468   :  { %690 = vmatpush.msra.mxu3 %v662_v26 }
 0x469   :  { %v510_v28 = vmax.f32 %v499_v27, 0.0  ;;  %v661_v27 = vld [vmem:[#allocation4 + $0x10] sm:$0xff] }
 0x46a   :  { %691 = vmatpush.msra.mxu3 %v661_v27 }
 0x46b   :  { %546 = vmatmul.f32.gmra.mxu0 %v510_v28  ;;  %v660_v28 = vld [vmem:[#allocation4 + $0x8] sm:$0xff] }
 0x46c   :  { %692 = vmatpush.msra.mxu3 %v660_v28 }
 0x46e   :  { %v501_v29 = vpop.f32.mrf.mxu3 }
 0x46f   :  { %v502_v30 = vadd.f32 %v1086_v53, %v501_v29 }
 0x471   :  { %v511_v31 = vmax.f32 %v502_v30, 0.0 }
 0x473   :  { %549 = vmatmul.f32.gmra.mxu0 %v511_v31 }
 0x4b8   :  { %v529_v32 = vpop.f32.mrf.mxu0 }
 0x4b9   :  { %v530_v33 = vadd.f32 %v1086_v53, %v529_v32  ;;  %v659_v32 = vld [vmem:[#allocation4] sm:$0xff] }
 0x4ba   :  { %693 = vmatpush.msra.mxu3 %v659_v32 }
 0x4bb   :  { %v553_v34 = vmax.f32 %v530_v33, 0.0 }
 0x4bd   :  { %577 = vmatmul.f32.vlgmr.msra.gmra.mxu1 %v553_v34 }
 0x4c0   :  { %v532_v35 = vpop.f32.mrf.mxu0 }
 0x4c1   :  { %v533_v36 = vadd.f32 %v1086_v53, %v532_v35 }
 0x4c3   :  { %v554_v37 = vmax.f32 %v533_v36, 0.0 }
 0x4c5   :  { %580 = vmatmul.f32.gmra.mxu1 %v554_v37 }
 0x4c8   :  { %v535_v38 = vpop.f32.mrf.mxu0 }
 0x4c9   :  { %v536_v39 = vadd.f32 %v1086_v53, %v535_v38 }
 0x4cb   :  { %v555_v40 = vmax.f32 %v536_v39, 0.0 }
 0x4cd   :  { %583 = vmatmul.f32.gmra.mxu1 %v555_v40 }
 0x4d0   :  { %v538_v41 = vpop.f32.mrf.mxu0 }
 0x4d1   :  { %v539_v42 = vadd.f32 %v1086_v53, %v538_v41 }
 0x4d3   :  { %v556_v43 = vmax.f32 %v539_v42, 0.0 }
 0x4d5   :  { %586 = vmatmul.f32.gmra.mxu1 %v556_v43 }
 0x4d8   :  { %v541_v44 = vpop.f32.mrf.mxu0 }
 0x4d9   :  { %v542_v45 = vadd.f32 %v1086_v53, %v541_v44 }
 0x4db   :  { %v557_v46 = vmax.f32 %v542_v45, 0.0 }
 0x4dd   :  { %589 = vmatmul.f32.gmra.mxu1 %v557_v46 }
 0x4e0   :  { %v544_v47 = vpop.f32.mrf.mxu0 }
 0x4e1   :  { %v545_v48 = vadd.f32 %v1086_v53, %v544_v47 }
 0x4e3   :  { %v558_v49 = vmax.f32 %v545_v48, 0.0 }
 0x4e5   :  { %592 = vmatmul.f32.gmra.mxu1 %v558_v49 }
 0x4e8   :  { %v547_v50 = vpop.f32.mrf.mxu0 }
 0x4e9   :  { %v548_v51 = vadd.f32 %v1086_v53, %v547_v50 }
 0x4eb   :  { %v559_v52 = vmax.f32 %v548_v51, 0.0 }
 0x4ed   :  { %595 = vmatmul.f32.gmra.mxu1 %v559_v52 }
 0x4f0   :  { %v550_v54 = vpop.f32.mrf.mxu0 }
 0x4f1   :  { %v551_v55 = vadd.f32 %v1086_v53, %v550_v54 }
 0x4f3   :  { %v560_v56 = vmax.f32 %v551_v55, 0.0 }
 0x4f5   :  { %598 = vmatmul.f32.gmra.mxu1 %v560_v56 }
 0x53a   :  { %v578_v57 = vpop.f32.mrf.mxu1 }
 0x53b   :  { %v579_v58 = vadd.f32 %v1086_v53, %v578_v57 }
 0x53d   :  { %v602_v59 = vmax.f32 %v579_v58, 0.0  ;;  %v747_v58 = vld [vmem:[%s1217_s6] ss:$0 sm:$0xff] }
 0x53f   :  { %626 = vmatmul.f32.vlgmr.msra.gmra.mxu2 %v602_v59 }
 0x542   :  { %v581_v60 = vpop.f32.mrf.mxu1 }
 0x543   :  { %v582_v61 = vadd.f32 %v1086_v53, %v581_v60 }
 0x545   :  { %v603_v62 = vmax.f32 %v582_v61, 0.0 }
 0x547   :  { %629 = vmatmul.f32.gmra.mxu2 %v603_v62 }
 0x54a   :  { %v584_v63 = vpop.f32.mrf.mxu1 }
 0x54b   :  { %v585_v0 = vadd.f32 %v1086_v53, %v584_v63 }
 0x54d   :  { %v604_v1 = vmax.f32 %v585_v0, 0.0 }
 0x54f   :  { %632 = vmatmul.f32.gmra.mxu2 %v604_v1 }
 0x552   :  { %v587_v2 = vpop.f32.mrf.mxu1 }
 0x553   :  { %v588_v3 = vadd.f32 %v1086_v53, %v587_v2 }
 0x555   :  { %v605_v4 = vmax.f32 %v588_v3, 0.0 }
 0x557   :  { %635 = vmatmul.f32.gmra.mxu2 %v605_v4 }
 0x55a   :  { %v590_v8 = vpop.f32.mrf.mxu1 }
 0x55b   :  { %v591_v9 = vadd.f32 %v1086_v53, %v590_v8 }
 0x55d   :  { %v606_v11 = vmax.f32 %v591_v9, 0.0 }
 0x55f   :  { %638 = vmatmul.f32.gmra.mxu2 %v606_v11 }
 0x562   :  { %v593_v15 = vpop.f32.mrf.mxu1 }
 0x563   :  { %v594_v16 = vadd.f32 %v1086_v53, %v593_v15 }
 0x565   :  { %v607_v18 = vmax.f32 %v594_v16, 0.0 }
 0x567   :  { %641 = vmatmul.f32.gmra.mxu2 %v607_v18 }
 0x56a   :  { %v596_v22 = vpop.f32.mrf.mxu1 }
 0x56b   :  { %v597_v23 = vadd.f32 %v1086_v53, %v596_v22 }
 0x56d   :  { %v608_v25 = vmax.f32 %v597_v23, 0.0 }
 0x56f   :  { %644 = vmatmul.f32.gmra.mxu2 %v608_v25 }
 0x572   :  { %v599_v29 = vpop.f32.mrf.mxu1 }
 0x573   :  { %v600_v30 = vadd.f32 %v1086_v53, %v599_v29 }
 0x575   :  { %v609_v31 = vmax.f32 %v600_v30, 0.0 }
 0x577   :  { %647 = vmatmul.f32.gmra.mxu2 %v609_v31 }
 0x5c2   :  { %v627_v33 = vpop.f32.mrf.mxu2 }
 0x5c3   :  { %v628_v34 = vadd.f32 %v1086_v53, %v627_v33 }
 0x5c5   :  { %v651_v35 = vmax.f32 %v628_v34, 0.0 }
 0x5c7   :  { %694 = vmatmul.f32.vlgmr.msra.gmra.mxu3 %v651_v35 }
 0x5ca   :  { %v630_v36 = vpop.f32.mrf.mxu2 }
 0x5cb   :  { %v631_v37 = vadd.f32 %v1086_v53, %v630_v36 }
 0x5cd   :  { %v652_v38 = vmax.f32 %v631_v37, 0.0 }
 0x5cf   :  { %697 = vmatmul.f32.gmra.mxu3 %v652_v38 }
 0x5d2   :  { %v633_v39 = vpop.f32.mrf.mxu2 }
 0x5d3   :  { %v634_v40 = vadd.f32 %v1086_v53, %v633_v39 }
 0x5d5   :  { %v653_v41 = vmax.f32 %v634_v40, 0.0 }
 0x5d7   :  { %700 = vmatmul.f32.gmra.mxu3 %v653_v41 }
 0x5da   :  { %v636_v42 = vpop.f32.mrf.mxu2 }
 0x5db   :  { %v637_v43 = vadd.f32 %v1086_v53, %v636_v42 }
 0x5dd   :  { %v654_v44 = vmax.f32 %v637_v43, 0.0 }
 0x5df   :  { %703 = vmatmul.f32.gmra.mxu3 %v654_v44 }
 0x5e2   :  { %v639_v45 = vpop.f32.mrf.mxu2 }
 0x5e3   :  { %v640_v46 = vadd.f32 %v1086_v53, %v639_v45 }
 0x5e5   :  { %v655_v47 = vmax.f32 %v640_v46, 0.0 }
 0x5e7   :  { %706 = vmatmul.f32.gmra.mxu3 %v655_v47 }
 0x5ea   :  { %v642_v48 = vpop.f32.mrf.mxu2 }
 0x5eb   :  { %v643_v49 = vadd.f32 %v1086_v53, %v642_v48 }
 0x5ed   :  { %v656_v50 = vmax.f32 %v643_v49, 0.0 }
 0x5ef   :  { %709 = vmatmul.f32.gmra.mxu3 %v656_v50 }
 0x5f2   :  { %v645_v51 = vpop.f32.mrf.mxu2 }
 0x5f3   :  { %v646_v52 = vadd.f32 %v1086_v53, %v645_v51 }
 0x5f5   :  { %v657_v54 = vmax.f32 %v646_v52, 0.0 }
 0x5f7   :  { %712 = vmatmul.f32.gmra.mxu3 %v657_v54 }
 0x5fa   :  { %v648_v55 = vpop.f32.mrf.mxu2 }
 0x5fb   :  { %v649_v56 = vadd.f32 %v1086_v53, %v648_v55 }
 0x5fd   :  { %v658_v57 = vmax.f32 %v649_v56, 0.0 }
 0x5ff   :  { %715 = vmatmul.f32.gmra.mxu3 %v658_v57 }
 0x64a   :  { %v695_v59 = vpop.f32.mrf.mxu3 }
 0x64b   :  { %v696_v60 = vadd.f32 %v747_v58, %v695_v59 }
 0x64d   :  { %719 = vst [vmem:[%s1218_s7] sm:$0xff] %v696_v60 }
 0x652   :  { %v698_v61 = vpop.f32.mrf.mxu3 }
 0x653   :  { %v699_v62 = vadd.f32 %v747_v58, %v698_v61 }
 0x655   :  { %720 = vst [vmem:[%s1218_s7 + $0x8] sm:$0xff] %v699_v62 }
 0x65a   :  { %v701_v63 = vpop.f32.mrf.mxu3 }
 0x65b   :  { %v702_v53 = vadd.f32 %v747_v58, %v701_v63 }
 0x65d   :  { %721 = vst [vmem:[%s1218_s7 + $0x10] sm:$0xff] %v702_v53 }
 0x662   :  { %v704_v0 = vpop.f32.mrf.mxu3 }
 0x663   :  { %v705_v1 = vadd.f32 %v747_v58, %v704_v0 }
 0x665   :  { %722 = vst [vmem:[%s1218_s7 + $0x18] sm:$0xff] %v705_v1 }
 0x66a   :  { %v707_v2 = vpop.f32.mrf.mxu3 }
 0x66b   :  { %v708_v3 = vadd.f32 %v747_v58, %v707_v2 }
 0x66d   :  { %723 = vst [vmem:[%s1218_s7 + $0x20] sm:$0xff] %v708_v3 }
 0x672   :  { %v710_v4 = vpop.f32.mrf.mxu3 }
 0x673   :  { %v711_v5 = vadd.f32 %v747_v58, %v710_v4 }
 0x675   :  { %724 = vst [vmem:[%s1218_s7 + $0x28] sm:$0xff] %v711_v5 }
 0x67a   :  { %v713_v6 = vpop.f32.mrf.mxu3 }
 0x67b   :  { %v714_v7 = vadd.f32 %v747_v58, %v713_v6 }
 0x67d   :  { %725 = vst [vmem:[%s1218_s7 + $0x30] sm:$0xff] %v714_v7 }
 0x682   :  { %v716_v8 = vpop.f32.mrf.mxu3 }
 0x683   :  { %v717_v9 = vadd.f32 %v747_v58, %v716_v8 }
 0x685   :  { %726 = vst [vmem:[%s1218_s7 + $0x38] sm:$0xff] %v717_v9 }
 0x686   :  { %731 = vsyncpa [#allocation3], 1 }
 0x687   :  { %732 = vsyncpa [#allocation5], 1 }

</bundles_post_ra>
